<compile_context>
chip_gen: v7x
topology: tpu7x:2x2x1
jax: 0.10.0
libtpu: 0.0.40
codegen_flags: <defaults>
</compile_context>

<pallas_src>
import jax
import jax.numpy as jnp
from jax.experimental import pallas as pl
from jax.experimental.pallas import tpu as pltpu


def _ia_gate_kernel(ia_ref, w1_ref, b1_ref, w2_ref, b2_ref, x_ref, o_ref):
    # Per-step blocks:
    #   ia_ref : (Bn, 1, in_dim)
    #   w1_ref : (in_dim, out_dim)   b1_ref : (1, out_dim)
    #   w2_ref : (out_dim, out_dim)  b2_ref : (1, out_dim)
    #   x_ref  : (Bn, C, H*W)        o_ref  : (Bn, C, H*W)
    ia = ia_ref[...][:, 0, :]                                      # (Bn, in_dim)

    # Linear 1 + (dropout = identity) + ReLU
    h = jnp.dot(ia, w1_ref[...], preferred_element_type=jnp.float32)
    h = jnp.maximum(h + b1_ref[...], 0.0)                          # (Bn, out_dim)

    # Linear 2 + (dropout = identity) + 1 + tanh
    a = jnp.dot(h, w2_ref[...], preferred_element_type=jnp.float32)
    a = 1.0 + jnp.tanh(a + b2_ref[...])                            # (Bn, out_dim) f32

    # Gate the feature map: broadcast a over the spatial (lane) axis.
    x = x_ref[...].astype(jnp.float32)
    o_ref[...] = (a[:, :, None] * x).astype(o_ref.dtype)


def _pick_block_batch(n, c, hw, itemsize,
                      target_block_bytes=1 << 20,      # ~1 MiB streaming tiles
                      vmem_budget_bytes=24 << 20):     # x+out, double-buffered (v7x-safe)
    per_sample = c * hw * itemsize
    bn = max(1, target_block_bytes // per_sample)
    bn = min(bn, max(1, vmem_budget_bytes // (4 * per_sample)))
    bn = min(bn, n)
    # Keep >= 2 grid steps when possible so both v7x TensorCores stream.
    if n >= 2 and pl.cdiv(n, bn) < 2:
        bn = pl.cdiv(n, 2)
    return int(bn)


def ia_gate_2_dp(x_nchw, ia_head, w1, b1, w2, b2):
    """x_nchw: (N, C, H, W); ia_head: (N, in_dim); C == out_dim == w1.shape[1]."""
    N, C, H, W = x_nchw.shape
    HW = H * W
    in_dim = ia_head.shape[1]
    out_dim = w1.shape[1]
    assert C == out_dim
    itemsize = jnp.dtype(x_nchw.dtype).itemsize

    bn = _pick_block_batch(N, C, HW, itemsize)
    grid = (pl.cdiv(N, bn),)

    # Lane-dense output: HW is the last (lane) dim; for this model HW is a
    # multiple of 128.  Blocks use the full C/HW extents so the (8,128) rule
    # is satisfied for any spatial size.
    x_flat = x_nchw.reshape(N, C, HW)
    ia3 = ia_head.reshape(N, 1, in_dim)
    b1_2d = b1.reshape(1, out_dim)
    b2_2d = b2.reshape(1, out_dim)

    block_bytes = bn * C * HW * itemsize
    vmem_limit = int(min(max(6 * block_bytes + (2 << 20), 16 << 20), 48 << 20))

    cost = pl.CostEstimate(
        flops=2 * N * (in_dim * out_dim + out_dim * out_dim) + N * C * HW,
        transcendentals=N * out_dim,
        bytes_accessed=2 * N * C * HW * itemsize
        + N * in_dim * jnp.dtype(ia_head.dtype).itemsize
        + (in_dim * out_dim + out_dim * out_dim + 2 * out_dim) * 4,
    )

    out_flat = pl.pallas_call(
        _ia_gate_kernel,
        out_shape=jax.ShapeDtypeStruct((N, C, HW), x_nchw.dtype),
        grid_spec=pltpu.PrefetchScalarGridSpec(
            num_scalar_prefetch=0,
            grid=grid,
            in_specs=[
                pl.BlockSpec((bn, 1, in_dim), lambda i: (i, 0, 0)),      # IA_head
                pl.BlockSpec((in_dim, out_dim), lambda i: (0, 0)),       # W1
                pl.BlockSpec((1, out_dim), lambda i: (0, 0)),            # b1
                pl.BlockSpec((out_dim, out_dim), lambda i: (0, 0)),      # W2
                pl.BlockSpec((1, out_dim), lambda i: (0, 0)),            # b2
                pl.BlockSpec((bn, C, HW), lambda i: (i, 0, 0)),          # x
            ],
            out_specs=pl.BlockSpec((bn, C, HW), lambda i: (i, 0, 0)),
        ),
        compiler_params=pltpu.CompilerParams(
            dimension_semantics=("parallel",),
            vmem_limit_bytes=vmem_limit,
        ),
        cost_estimate=cost,
    )(ia3, w1, b1_2d, w2, b2_2d, x_flat)

    return out_flat.reshape(N, C, H, W)


def _init_linear(key, fan_in, fan_out):
    """Deterministic PyTorch-style nn.Linear init; weight stored as (in, out)."""
    kw, kb = jax.random.split(key)
    bound = 1.0 / (fan_in ** 0.5)
    w = jax.random.uniform(kw, (fan_in, fan_out), jnp.float32, -bound, bound)
    b = jax.random.uniform(kb, (fan_out,), jnp.float32, -bound, bound)
    return w, b


def _reference(x, ia_head, w1, b1, w2, b2):
    a = ia_head @ w1 + b1
    a = jnp.maximum(a, 0.0)
    a = a @ w2 + b2
    a = 1.0 + jnp.tanh(a)
    return a[:, :, None, None] * x


if __name__ == "__main__":
    # Small shapes consistent with the module: IA_head (N, in_dim), x (N, out_dim, H, W)
    N, in_dim, out_dim, H, W = 2, 32, 8, 16, 16

    key = jax.random.PRNGKey(0)
    k_x, k_ia, k_l1, k_l2 = jax.random.split(key, 4)

    x = jax.random.normal(k_x, (N, out_dim, H, W), jnp.float32)
    ia_head = jax.random.normal(k_ia, (N, in_dim), jnp.float32)

    w1, b1 = _init_linear(k_l1, in_dim, out_dim)
    w2, b2 = _init_linear(k_l2, out_dim, out_dim)

    out = ia_gate_2_dp(x, ia_head, w1, b1, w2, b2)
    out = jax.block_until_ready(out)

    ref = _reference(x, ia_head, w1, b1, w2, b2)
    assert out.shape == (N, out_dim, H, W)
    assert jnp.allclose(out, ref, atol=1e-5, rtol=1e-5)

    print("KERNEL_OK")
</pallas_src>

<mosaic_0001>
module attributes {stable_mosaic.version = 11 : i64} {
  func.func @_ia_gate_kernel(%arg0: i32, %arg1: memref<1x1x32xf32, #tpu.memory_space<vmem>>, %arg2: memref<32x8xf32, #tpu.memory_space<vmem>>, %arg3: memref<1x8xf32, #tpu.memory_space<vmem>>, %arg4: memref<8x8xf32, #tpu.memory_space<vmem>>, %arg5: memref<1x8xf32, #tpu.memory_space<vmem>>, %arg6: memref<1x8x256xf32, #tpu.memory_space<vmem>>, %arg7: memref<1x8x256xf32, #tpu.memory_space<vmem>>) attributes {dimension_semantics = [#tpu.dimension_semantics<parallel>], iteration_bounds = array<i64: 2>, scalar_prefetch = 0 : i64, scratch_operands = 0 : i64, tpu.core_type = #tpu.core_type<tc>, window_params = [{transform_indices = @transform_0, window_bounds = array<i64: 1, 1, 32>}, {pipeline_mode = #tpu.pipeline_mode<synchronous>, transform_indices = @transform_1, window_bounds = array<i64: 32, 8>}, {pipeline_mode = #tpu.pipeline_mode<synchronous>, transform_indices = @transform_2, window_bounds = array<i64: 1, 8>}, {pipeline_mode = #tpu.pipeline_mode<synchronous>, transform_indices = @transform_3, window_bounds = array<i64: 8, 8>}, {pipeline_mode = #tpu.pipeline_mode<synchronous>, transform_indices = @transform_4, window_bounds = array<i64: 1, 8>}, {transform_indices = @transform_5, window_bounds = array<i64: 1, 8, 256>}, {transform_indices = @transform_6, window_bounds = array<i64: 1, 8, 256>}]} {
    %c0 = arith.constant 0 : index
    %c0_0 = arith.constant 0 : index
    %c0_1 = arith.constant 0 : index
    %0 = vector.load %arg1[%c0, %c0_0, %c0_1] : memref<1x1x32xf32, #tpu.memory_space<vmem>>, vector<1x1x32xf32>
    %1 = vector.shape_cast %0 : vector<1x1x32xf32> to vector<1x32xf32>
    %c0_2 = arith.constant 0 : index
    %c0_3 = arith.constant 0 : index
    %2 = vector.load %arg2[%c0_2, %c0_3] : memref<32x8xf32, #tpu.memory_space<vmem>>, vector<32x8xf32>
    %cst = arith.constant dense<0.000000e+00> : vector<1x8xf32>
    %3 = tpu.matmul %1, %2, %cst {dimension_numbers = #tpu.dot_dimension_numbers<[1], [0], [0], [1], [0, 0, 1, 1], [], []>} : vector<1x32xf32>, vector<32x8xf32>, vector<1x8xf32> -> vector<1x8xf32>
    %c0_4 = arith.constant 0 : index
    %c0_5 = arith.constant 0 : index
    %4 = vector.load %arg3[%c0_4, %c0_5] : memref<1x8xf32, #tpu.memory_space<vmem>>, vector<1x8xf32>
    %5 = arith.addf %3, %4 : vector<1x8xf32>
    %cst_6 = arith.constant 0.000000e+00 : f32
    %6 = vector.broadcast %cst_6 : f32 to vector<1x8xf32>
    %7 = arith.maximumf %5, %6 : vector<1x8xf32>
    %c0_7 = arith.constant 0 : index
    %c0_8 = arith.constant 0 : index
    %8 = vector.load %arg4[%c0_7, %c0_8] : memref<8x8xf32, #tpu.memory_space<vmem>>, vector<8x8xf32>
    %cst_9 = arith.constant dense<0.000000e+00> : vector<1x8xf32>
    %9 = tpu.matmul %7, %8, %cst_9 {dimension_numbers = #tpu.dot_dimension_numbers<[1], [0], [0], [1], [0, 0, 1, 1], [], []>} : vector<1x8xf32>, vector<8x8xf32>, vector<1x8xf32> -> vector<1x8xf32>
    %c0_10 = arith.constant 0 : index
    %c0_11 = arith.constant 0 : index
    %10 = vector.load %arg5[%c0_10, %c0_11] : memref<1x8xf32, #tpu.memory_space<vmem>>, vector<1x8xf32>
    %11 = arith.addf %9, %10 : vector<1x8xf32>
    %12 = math.tanh %11 : vector<1x8xf32>
    %cst_12 = arith.constant 1.000000e+00 : f32
    %13 = vector.broadcast %cst_12 : f32 to vector<1x8xf32>
    %14 = arith.addf %13, %12 : vector<1x8xf32>
    %c0_13 = arith.constant 0 : index
    %c0_14 = arith.constant 0 : index
    %c0_15 = arith.constant 0 : index
    %15 = vector.load %arg6[%c0_13, %c0_14, %c0_15] : memref<1x8x256xf32, #tpu.memory_space<vmem>>, vector<1x8x256xf32>
    %16 = vector.shape_cast %14 : vector<1x8xf32> to vector<1x8x1xf32>
    %17 = vector.broadcast %16 : vector<1x8x1xf32> to vector<1x8x256xf32>
    %18 = arith.mulf %17, %15 : vector<1x8x256xf32>
    %c0_16 = arith.constant 0 : index
    %c0_17 = arith.constant 0 : index
    %c0_18 = arith.constant 0 : index
    %19 = vector.load %arg7[%c0_16, %c0_17, %c0_18] : memref<1x8x256xf32, #tpu.memory_space<vmem>>, vector<1x8x256xf32>
    tpu.vector_store %arg7[%c0_16, %c0_17, %c0_18], %18 {strides = array<i32>} : memref<1x8x256xf32, #tpu.memory_space<vmem>>, vector<1x8x256xf32>,
    return
  }
  func.func @transform_0(%arg0: i32) -> (i32, i32, i32) {
    %c0_i32 = arith.constant 0 : i32
    %c0_i32_0 = arith.constant 0 : i32
    %c0_i32_1 = arith.constant 0 : i32
    return %arg0, %c0_i32, %c0_i32_0 : i32, i32, i32
  }
  func.func @transform_1(%arg0: i32) -> (i32, i32) {
    %c0_i32 = arith.constant 0 : i32
    %c0_i32_0 = arith.constant 0 : i32
    %c0_i32_1 = arith.constant 0 : i32
    return %c0_i32, %c0_i32_0 : i32, i32
  }
  func.func @transform_2(%arg0: i32) -> (i32, i32) {
    %c0_i32 = arith.constant 0 : i32
    %c0_i32_0 = arith.constant 0 : i32
    %c0_i32_1 = arith.constant 0 : i32
    return %c0_i32, %c0_i32_0 : i32, i32
  }
  func.func @transform_3(%arg0: i32) -> (i32, i32) {
    %c0_i32 = arith.constant 0 : i32
    %c0_i32_0 = arith.constant 0 : i32
    %c0_i32_1 = arith.constant 0 : i32
    return %c0_i32, %c0_i32_0 : i32, i32
  }
  func.func @transform_4(%arg0: i32) -> (i32, i32) {
    %c0_i32 = arith.constant 0 : i32
    %c0_i32_0 = arith.constant 0 : i32
    %c0_i32_1 = arith.constant 0 : i32
    return %c0_i32, %c0_i32_0 : i32, i32
  }
  func.func @transform_5(%arg0: i32) -> (i32, i32, i32) {
    %c0_i32 = arith.constant 0 : i32
    %c0_i32_0 = arith.constant 0 : i32
    %c0_i32_1 = arith.constant 0 : i32
    return %arg0, %c0_i32, %c0_i32_0 : i32, i32, i32
  }
  func.func @transform_6(%arg0: i32) -> (i32, i32, i32) {
    %c0_i32 = arith.constant 0 : i32
    %c0_i32_0 = arith.constant 0 : i32
    %c0_i32_1 = arith.constant 0 : i32
    return %arg0, %c0_i32, %c0_i32_0 : i32, i32, i32
  }
}

</mosaic_0001>

<bundles_post_ra>
// kernel: tpu_custom_call.1
= control target key start
LH: loop header
LB: loop body
LE: loop exit
PB: predicated region body
PF: predicated region fallthrough
CT: control target
= control target key end

     0   :  { %11 = vsyncpa [#allocation3], 0  ;;  %s839_s0 = inlined_call_operand.vmem [shape: f32[2,1,32], index: 0, kind: input, shape index: {}]   ;;  %s840_s1 = inlined_call_operand.vmem [shape: f32[32,8], index: 1, kind: input, shape index: {}]   ;;  %s841_s2 = inlined_call_operand.vmem [shape: f32[1,8], index: 2, kind: input, shape index: {}]   ;;  %s842_s3 = inlined_call_operand.vmem [shape: f32[8,8], index: 3, kind: input, shape index: {}]   ;;  %s843_s4 = inlined_call_operand.vmem [shape: f32[1,8], index: 4, kind: input, shape index: {}]   ;;  %s844_s5 = inlined_call_operand.vmem [shape: f32[2,8,256], index: 5, kind: input, shape index: {}]   ;;  %s845_s6 = inlined_call_operand.hbm [shape: f32[2,8,256], index: 6, kind: output, shape index: {}]  }
   0x1   :  { %13 = vsyncpa [#allocation3 + $0x1], 0  ;;  %s711_s21 = smov 0   ;;  %s713_s22 = smov 0  }
   0x2   :  { %s715_s23 = smov 0   ;;  %s717_s24 = smov 0  }
   0x3 LB: > { %s732_s25 = sadd.s32 4294967295, %s670_s24   ;;  %s519_s26 = sadd.s32 4294967294, %s670_s24   ;;  %s670_s24 = sphi %s717_s24, %s851_s24   ;;  %s666_s23 = sphi %s715_s23, %s850_s23   ;;  %s662_s22 = sphi %s713_s22, %s849_s22   ;;  %s658_s21 = sphi %s711_s21, %s848_s21  }
   0x4   : > { %s736_s27 = sadd.s32 1, %s670_s24   ;;  %s162_s28 = sadd.s32 1, %s666_s23 }
   0x5   : > { %s159_s29 = ssub.s32 %s670_s24, %s736_s27  ;;  %p172_p0 = scmp.ne.s32.totalorder %s666_s23, %s662_s22 }
   0x6   : > { %p160_p1 = scmp.eq.s32.totalorder %s159_s29, 0  ;;  %p173_p2 = scmp.eq.s32.totalorder %s732_s25, 1 }
   0x7   : > { %p178_p3 = scmp.ne.s32.totalorder %s662_s22, %s658_s21  ;;  %p179_p4 = scmp.eq.s32.totalorder %s519_s26, 1 }
   0x8   : > { %s747_s30 = scalar_select %p160_p1, %s666_s23, %s162_s28  }
   0x9   : > { %p749_p5 = por %p173_p2, %p172_p0  ;;  %p753_p6 = por %p179_p4, %p178_p3 }
   0xa   : > { %p522_p7 = scmp.ge.s32.totalorder %s670_s24, 1  ;;  %p223_p8 = scmp.lt.s32.totalorder %s670_s24, 3 }
   0xc   : > { %p224_p9 = pnand %p522_p7, %p223_p8 }
   0xd   : > { %v265_v0 = vld [vmem:[%s840_s1] sm:$0xff] (!%p224_p9)  ;;  %v266_v1 = vld [vmem:[%s840_s1 + $0x8] sm:$0xff] (!%p224_p9)  ;;  %v267_v2 = vld [vmem:[%s840_s1 + $0x10] sm:$0xff] (!%p224_p9)  ;;  %v672_v3 = vmov (!%p224_p9), 0.0|0.0   ;;  %vm673_vm0 = vmmov (!%p224_p9), 0   ;;  %v674_v6 = vmov (!%p224_p9), 0.0   ;;  %v425_v19 = vlaneseq (!%p224_p9) }
   0xe   : > { %227 = sbr.rel (%p224_p9) target bundleno = 601 (0x259), region = 44  ;;  %558 = vmatprep.subr.bf16.mxu0 (!%p224_p9), %v672_v3  ;;  %v559_v4 = vpack.c.bf16 (!%p224_p9), %v266_v1, %v265_v0  ;;  %v268_v5 = vld [vmem:[%s840_s1 + $0x18] sm:$0xff] (!%p224_p9)  ;;  %550 = vmatprep.mubr.msk.f32.mxu0 (!%p224_p9), %vm673_vm0, %v674_v6  ;;  %p256_p10 = scmp.lt.s32.totalorder (!%p224_p9), %s732_s25, 1  ;;  %vm270_vm1 = vcmask (!%p224_p9), 261120   ;;  %v345_v9 = vld [vmem:[%s842_s3] sm:$0xff] (!%p224_p9)  ;;  %vm347_vm2 = vcmask (!%p224_p9), 64512  }
   0xf   : > { %553 = vmatprep.subr.mxu1 (!%p224_p9), %v674_v6  ;;  %555 = vmatprep.mubr.msk.f32.mxu1 (!%p224_p9), %vm673_vm0, %v674_v6  ;;  %v562_v7 = vpack.c.bf16 (!%p224_p9), %v268_v5, %v267_v2  ;;  %v269_v10 = vld [vmem:[%s841_s2] sm:$0x1] (!%p224_p9)  ;;  %v426_v20 = vshrl.u32 (!%p224_p9), %v425_v19, 7  ;;  %s253_s12 = sand.u32 (!%p224_p9), 1, %s662_s22   ;;  %s534_s19 = sshll.u32 (!%p224_p9), %s732_s25, 8 }
  0x10   : > { %560 = vmatpush3.bf16.msra.mxu0 (!%p224_p9), %v559_v4  ;;  %554 = vmatpush3.msra.mxu1 (!%p224_p9), %v345_v9  ;;  %v346_v15 = vld [vmem:[%s843_s4] sm:$0x1] (!%p224_p9)  ;;  %s523_s13 = sshll.u32 (!%p224_p9), %s253_s12, 4  ;;  %s797_s9 = scalar_lea.hbm (!%p224_p9), %s845_s6, %s534_s19 }
  0x11   : > { %561 = vmatprep.subr.bf16.mxu0 (!%p224_p9), %v672_v3  ;;  %v427_v21 = vsub.s32 (!%p224_p9), 0, %v426_v20 }
  0x14   : > { %563 = vmatpush3.bf16.msra.mxu0 (!%p224_p9), %v562_v7 }
  0x15   : > { %s773_s17 = scalar_select %p256_p10, %s732_s25, 1 }
  0x16   : > { %s675_s25 = smov [#allocation2]  }
  0x17   : > { %s258_s20 = scalar_lea.vmem %s839_s0, %s773_s17  ;;  %s533_s14 = sshll.u32 %s773_s17, 4 }
  0x18   : > { %v264_v8 = vld [vmem:[%s258_s20] sm:$0x1]  ;;  %s263_s18 = scalar_lea.vmem %s844_s5, %s533_s14  ;;  %s255_s20 = scalar_lea.vmem [#allocation2], %s523_s13 }
  0x19   : > { %551 = vmatmul.mubr.msk.f32.vlgmr.msra.gmra.mrb[0].mxu0 %vm270_vm1, %v264_v8  ;;  %v423_v25 = vld [vmem:[%s263_s18] sm:$0xff]  ;;  %v424_v26 = vld [vmem:[%s263_s18 + $0x8] sm:$0xff]  ;;  %s451_s26 = sshll.u32 %s255_s20, 4  ;;  %s437_s17 = scalar_lea.sflag [#allocation3], %s253_s12  ;;  %s799_s26 = int_to_ptr.vmem [resolvable:$true] %s451_s26 }
  0x1a   : > { %s608_s10 = scalar_lea.vmem %s799_s26, 256  ;;  %s612_s11 = sshll.u32 %s675_s25, 4  ;;  %s613_s11 = int_to_ptr.vmem [resolvable:$false] %s612_s11 }
  0x1b   : > { %p609_p11 = scmp.ne.s32.totalorder %s799_s26, %s608_s10  ;;  %s614_s13 = scalar_lea.vmem %s613_s11, 512 }
  0x1c   : > { %p615_p0 = scmp.lt.s32.totalorder %s799_s26, %s613_s11  ;;  %p616_p1 = scmp.lt.s32.totalorder %s614_s13, %s608_s10 }
  0x1d   : > { %p610_p12 = pnand %p609_p11, %p749_p5 }
  0x1e   : > { %p617_p2 = por %p616_p1, %p615_p0 }
  0x1f   : > { %p611_p13 = pneg %p610_p12 }
  0x21   : > { %p618_p3 = pnand %p617_p2, %p611_p13 }
  0xec   : > { %v340_v11 = vpop.f32.mrb[0].mxu0 }
  0xed   : > { %v341_v12 = vadd.f32 %v340_v11, %v269_v10  ;;  %v552_v13 = vpop.f32.mrb[1].mxu0 }
  0xef   : > { %v344_v14 = vmax.f32 %v341_v12, 0.0 }
  0xf1   : > { %556 = vmatmul.mubr.msk.f32.vlgmr.msra.gmra.mrb[0].mxu1 %vm347_vm2, %v344_v14 }
 0x1c4   : > { %v417_v16 = vpop.f32.mrb[0].mxu1 }
 0x1c5   : > { %v418_v17 = vadd.f32 %v417_v16, %v346_v15  ;;  %v557_v18 = vpop.f32.mrb[1].mxu1 }
 0x1c7   : > { %606 = vtanh.f32 %v418_v17 }
 0x1d1   : > { %v607_v22 = vpop.eup %606 }
 0x1d2   : > { %v422_v23 = vadd.f32 1.0, %v607_v22 }
 0x1d4   : > { %v428_v24 = vrot.slane %v422_v23, %v427_v21 }
 0x1d6   : > { %430 = vbcast.lane.b32.xlu0 %v428_v24, 256 }
 0x248   : > { %v431_v27 = vpop.permute.xlu0 %430 }
 0x249   : > { %v432_v28 = vmul.f32 %v431_v27, %v423_v25  ;;  %v433_v29 = vmul.f32 %v431_v27, %v424_v26 }
 0x24b   : > { %434 = vst [vmem:[%s255_s20] sm:$0xff] %v432_v28  ;;  %435 = vst [vmem:[%s255_s20 + $0x8] sm:$0xff] %v433_v29 }
 0x24c   : > { %621 = shalt.err (!%p618_p3)
}
 0x24d   : > { %s622_s12 = scalar_lea.hbm %s797_s9, 256  ;;  %s626_s16 = scalar_lea.hbm %s845_s6, 512 }
 0x24e   : > { %p623_p4 = scmp.ne.s32.totalorder %s797_s9, %s622_s12  ;;  %p627_p9 = scmp.lt.u32.totalorder %s797_s9, %s845_s6 }
 0x24f   : > { %p628_p10 = scmp.lt.u32.totalorder %s626_s16, %s622_s12  ;;  %p630_p12 = scmp.lt.u32.totalorder %s622_s12, %s797_s9 }
 0x250   : > { %p624_p7 = pnand %p623_p4, %p749_p5 }
 0x251   : > { %p629_p11 = por %p628_p10, %p627_p9 }
 0x252   : > { %p625_p8 = pneg %p624_p7 }
 0x253   : > { %p631_p13 = por %p630_p12, %p629_p11 }
 0x255   : > { %p632_p0 = pnand %p631_p13, %p625_p8 }
 0x257   : > { %635 = shalt.err (!%p632_p0)
}
 0x258   : > { %564 = dma.vmem_to_hbm [thread:$0]  (%p749_p5), %s799_s26, 256, %s797_s9, %s437_s17  }
 0x259 PF: > { %p570_p1 = scmp.ge.s32.totalorder %s670_s24, 2  ;;  %s463_s20 = sand.u32 1, %s658_s21  }
 0x25a   : > { %s464_s28 = scalar_lea.sflag [#allocation3], %s463_s20 }
 0x25b   : > { %p567_p2 = pnand %p570_p1, %p753_p6 }
 0x25d   : > { %653 = dma.done.wait (!%p567_p2), %s464_s28, 256  }
 0x25e   : > { %655 = vsyncadd (!%p567_p2), %s464_s28, 4294967040  ;;  %p16_p3 = scmp.ge.s32.totalorder %s736_s27, 4   ;;  %s848_s21 = smov %s662_s22 }
 0x25f   : > { %s849_s22 = smov %s666_s23  ;;  %s850_s23 = smov %s747_s30 }
 0x260   : > { %s851_s24 = smov %s736_s27  ;;  %18 = sbr.rel (!%p16_p3) target bundleno = 3 (0x3), region = 82 }
 0x267   :  { %469 = vsyncpa [#allocation3], 1 }
 0x268   :  { %471 = vsyncpa [#allocation3 + $0x1], 1 }

</bundles_post_ra>
